<compile_context>
chip_gen: v5e
topology: v5e:2x2
jax: 0.10.0
libtpu: 0.0.40
codegen_flags: <defaults>
</compile_context>

<pallas_src>
import jax
import jax.numpy as jnp
import numpy as np
from jax import lax
from jax.experimental import pallas as pl
from jax.experimental.pallas import tpu as pltpu

SEQ_LEN = 8
HIDDEN = 128
HEAD_DIMS = [33, 65, 129, 257, 2, 3, 5, 2]
HEAD_OFFS = [0]
for _d in HEAD_DIMS:
    HEAD_OFFS.append(HEAD_OFFS[-1] + _d)                       # total 496
OUT_WIDTH = ((HEAD_OFFS[-1] + 127) // 128) * 128               # 512, lane-dense

# Row layout of the packed "small" weight slab (lane width 128 everywhere).
R_W1, R_W2, R_WIH, R_WHH = 0, 128, 256, 384
R_B1, R_B2, R_BRNN = 512, 520, 528
SMALL_ROWS = 536
HEAD_ROWS = 136          # 128 weight rows + 1 bias row, padded to multiple of 8

VMEM = pl.BlockSpec(memory_space=pltpu.MemorySpace.VMEM)


# ----------------------------------------------------------------- kernel ----

def _mapper_kernel(x_ref, small_ref, head_hbm_ref, o_ref, head_vmem, sem):
    # Kick off the only sizeable DMA immediately; it overlaps with the serial
    # scale-MLP + 8-step RNN chain below and is waited on right before use.
    head_cp = pltpu.make_async_copy(head_hbm_ref, head_vmem, sem)
    head_cp.start()

    # Static (zero-cost) carve-outs from the packed small-weight slab.
    w1 = small_ref[R_W1:R_W1 + HIDDEN, :]
    w2 = small_ref[R_W2:R_W2 + HIDDEN, :]
    wih = small_ref[R_WIH:R_WIH + HIDDEN, :]
    whh = small_ref[R_WHH:R_WHH + HIDDEN, :]
    b1 = small_ref[R_B1:R_B1 + 1, :]
    b2 = small_ref[R_B2:R_B2 + 1, :]
    brnn = small_ref[R_BRNN:R_BRNN + 1, :]

    # Scale MLP (inputs/weights zero-padded to 128 wrapper-side; tanh(0)=0
    # keeps pad lanes zero all the way through).
    h64 = jnp.tanh(jnp.dot(x_ref[...], w1,
                           preferred_element_type=jnp.float32) + b1)
    feats = jnp.tanh(jnp.dot(h64, w2,
                             preferred_element_type=jnp.float32) + b2)

    # The PyTorch model feeds the SAME vector at every timestep
    # (x.unsqueeze(0).repeat(8,1,1)), so feats @ W_ih + (b_ih + b_hh) is
    # hoisted out of the fully unrolled T=8 loop.  h0 = 0, nonlinearity = tanh.
    xw = jnp.dot(feats, wih, preferred_element_type=jnp.float32) + brnn
    # TODO(synk): hold W_hh resident in MXU weight registers across the 8
    # serial steps (pltpu.matmul_push_rhs / matmul_acc_lhs / matmul_pop) once
    # per-generation accumulator-reset semantics (MRF vs v7x MRB) are verified.
    h = jnp.zeros_like(xw)
    hs = []
    for _ in range(SEQ_LEN):
        h = jnp.tanh(xw + jnp.dot(h, whh, preferred_element_type=jnp.float32))
        hs.append(h)

    # Head stage: heads are packed DENSELY into one (128, 512) matrix, so
    # stacking the 8 hidden states along sublanes lets ONE matmul evaluate
    # every head on every timestep; each timestep's own column block is then
    # selected in-register with iota masks and written with a single
    # lane-dense (B, 512) store.
    hcat = jnp.concatenate(hs, axis=0)                         # (8*B, 128)

    head_cp.wait()                                             # DMA done by now
    wh = head_vmem[0:HIDDEN, :]                                # (128, 512)
    bh = head_vmem[HIDDEN:HIDDEN + 1, :]                       # (1, 512)
    r = jnp.dot(hcat, wh, preferred_element_type=jnp.float32)  # (8*B, 512)

    B = x_ref.shape[0]
    col = lax.broadcasted_iota(jnp.int32, (B, OUT_WIDTH), 1)
    out = jnp.zeros((B, OUT_WIDTH), jnp.float32)
    for t in range(SEQ_LEN):
        mask = (col >= HEAD_OFFS[t]) & (col < HEAD_OFFS[t + 1])
        out = out + jnp.where(mask, r[t * B:(t + 1) * B, :], 0.0)
    o_ref[...] = out + bh                                      # pad cols stay 0


# ---------------------------------------------------------------- wrappers ----

def pack_params(params):
    """Consolidate the ~40 small PyTorch-style tensors into 2 lane-aligned slabs."""
    (w1, b1), (w2, b2) = params["scale1"], params["scale2"]

    small = jnp.zeros((SMALL_ROWS, HIDDEN), jnp.float32)
    small = small.at[R_W1:R_W1 + w1.shape[0], : w1.shape[1]].set(w1)
    small = small.at[R_W2:R_W2 + w2.shape[0], :].set(w2)
    small = small.at[R_WIH:R_WIH + HIDDEN, :].set(params["wih"])
    small = small.at[R_WHH:R_WHH + HIDDEN, :].set(params["whh"])
    small = small.at[R_B1:R_B1 + 1, : b1.shape[1]].set(b1)
    small = small.at[R_B2:R_B2 + 1, :].set(b2)
    small = small.at[R_BRNN:R_BRNN + 1, :].set(params["bih"] + params["bhh"])

    # Collapse each head's activation-free Linear chain into one affine map and
    # pack all 8 DENSELY into (128, 512) weights + a (1, 512) bias row.
    head = jnp.zeros((HEAD_ROWS, OUT_WIDTH), jnp.float32)
    for t, layers in enumerate(params["heads"]):
        W, b = layers[0]
        for w, bb in layers[1:]:
            b = b @ w + bb
            W = W @ w
        lo, hi = HEAD_OFFS[t], HEAD_OFFS[t + 1]
        head = head.at[0:HIDDEN, lo:hi].set(W)
        head = head.at[HIDDEN:HIDDEN + 1, lo:hi].set(b)

    return {"small": small, "head": head}


@jax.jit
def mapper_forward(x, packed):
    B = x.shape[0]
    x_pad = jnp.zeros((B, HIDDEN), jnp.float32).at[:, : x.shape[1]].set(x)
    slab = pl.pallas_call(
        _mapper_kernel,
        out_shape=jax.ShapeDtypeStruct((B, OUT_WIDTH), jnp.float32),
        in_specs=[VMEM, VMEM, pl.BlockSpec(memory_space=pl.ANY)],
        out_specs=VMEM,
        scratch_shapes=[pltpu.VMEM((HEAD_ROWS, OUT_WIDTH), jnp.float32),
                        pltpu.SemaphoreType.DMA],
    )(x_pad, packed["small"], packed["head"])
    return [slab[:, HEAD_OFFS[t]:HEAD_OFFS[t + 1]] for t in range(SEQ_LEN)]


# ------------------------------------------------------------------- setup ----

def init_linear(key, fan_in, fan_out):
    # deterministic init mirroring PyTorch's U(-1/sqrt(fan_in), 1/sqrt(fan_in))
    kw, kb = jax.random.split(key)
    bound = 1.0 / np.sqrt(fan_in)
    w = jax.random.uniform(kw, (fan_in, fan_out), jnp.float32, -bound, bound)
    b = jax.random.uniform(kb, (1, fan_out), jnp.float32, -bound, bound)
    return w, b


def build_params(key):
    keys = iter(jax.random.split(key, 64))
    params = {}
    params["scale1"] = init_linear(next(keys), 32, 64)
    params["scale2"] = init_linear(next(keys), 64, 128)
    params["wih"], params["bih"] = init_linear(next(keys), 128, 128)
    params["whh"], params["bhh"] = init_linear(next(keys), 128, 128)
    head_dims = [
        [(128, 64), (64, 32 + 1)],              # trans1
        [(128, 64 + 1)],                        # trans2
        [(128, 128 + 1)],                       # trans3
        [(128, 256 + 1)],                       # trans4
        [(128, 64), (64, 32), (32, 2)],         # trans5
        [(128, 64), (64, 32), (32, 3)],         # trans6
        [(128, 64), (64, 32), (32, 5)],         # trans7
        [(128, 64), (64, 32), (32, 2)],         # trans8
    ]
    params["heads"] = [[init_linear(next(keys), fi, fo) for fi, fo in dims]
                       for dims in head_dims]
    return params


def reference_forward(x, params):
    (w1, b1), (w2, b2) = params["scale1"], params["scale2"]
    f = jnp.tanh(jnp.tanh(x @ w1 + b1) @ w2 + b2)
    h = jnp.zeros((x.shape[0], 128), jnp.float32)
    hps = []
    for t in range(SEQ_LEN):
        h = jnp.tanh(f @ params["wih"] + params["bih"]
                     + h @ params["whh"] + params["bhh"])
        z = h
        for w, b in params["heads"][t]:
            z = z @ w + b
        hps.append(z)
    return hps


if __name__ == "__main__":
    root = jax.random.PRNGKey(0)
    k_params, k_x = jax.random.split(root)
    params = build_params(k_params)
    packed = pack_params(params)

    B = 8
    x = jax.random.normal(k_x, (B, 32), jnp.float32)

    hps = mapper_forward(x, packed)
    hps = [jax.block_until_ready(h) for h in hps]

    assert [h.shape for h in hps] == [(B, d) for d in HEAD_DIMS]

    refs = reference_forward(x, params)
    for got, ref in zip(hps, refs):
        np.testing.assert_allclose(np.asarray(got), np.asarray(ref),
                                   rtol=1e-4, atol=1e-4)

    print("KERNEL_OK")
</pallas_src>

<mosaic_0001>
module attributes {stable_mosaic.version = 11 : i64} {
  func.func @_mapper_kernel(%arg0: memref<8x128xf32, #tpu.memory_space<vmem>>, %arg1: memref<536x128xf32, #tpu.memory_space<vmem>>, %arg2: memref<136x512xf32, #tpu.memory_space<any>>, %arg3: memref<8x512xf32, #tpu.memory_space<vmem>>, %arg4: memref<136x512xf32, #tpu.memory_space<vmem>>, %arg5: memref<!tpu.dma_semaphore, #tpu.memory_space<semaphore_mem>>) attributes {dimension_semantics = [], scalar_prefetch = 0 : i64, scratch_operands = 2 : i64, tpu.core_type = #tpu.core_type<tc>} {
    tpu.enqueue_dma source(%arg2 : memref<136x512xf32, #tpu.memory_space<any>>) target(%arg4 : memref<136x512xf32, #tpu.memory_space<vmem>>) target_semaphore(%arg5 : memref<!tpu.dma_semaphore, #tpu.memory_space<semaphore_mem>>)
    %c0 = arith.constant 0 : index
    %c0_0 = arith.constant 0 : index
    %0 = vector.load %arg1[%c0, %c0_0] : memref<536x128xf32, #tpu.memory_space<vmem>>, vector<128x128xf32>
    %c128 = arith.constant 128 : index
    %c0_1 = arith.constant 0 : index
    %1 = vector.load %arg1[%c128, %c0_1] : memref<536x128xf32, #tpu.memory_space<vmem>>, vector<128x128xf32>
    %c256 = arith.constant 256 : index
    %c0_2 = arith.constant 0 : index
    %2 = vector.load %arg1[%c256, %c0_2] : memref<536x128xf32, #tpu.memory_space<vmem>>, vector<128x128xf32>
    %c384 = arith.constant 384 : index
    %c0_3 = arith.constant 0 : index
    %3 = vector.load %arg1[%c384, %c0_3] : memref<536x128xf32, #tpu.memory_space<vmem>>, vector<128x128xf32>
    %c512 = arith.constant 512 : index
    %c0_4 = arith.constant 0 : index
    %4 = vector.load %arg1[%c512, %c0_4] : memref<536x128xf32, #tpu.memory_space<vmem>>, vector<1x128xf32>
    %c520 = arith.constant 520 : index
    %c0_5 = arith.constant 0 : index
    %5 = vector.load %arg1[%c520, %c0_5] : memref<536x128xf32, #tpu.memory_space<vmem>>, vector<1x128xf32>
    %c528 = arith.constant 528 : index
    %c0_6 = arith.constant 0 : index
    %6 = vector.load %arg1[%c528, %c0_6] : memref<536x128xf32, #tpu.memory_space<vmem>>, vector<1x128xf32>
    %c0_7 = arith.constant 0 : index
    %c0_8 = arith.constant 0 : index
    %7 = vector.load %arg0[%c0_7, %c0_8] : memref<8x128xf32, #tpu.memory_space<vmem>>, vector<8x128xf32>
    %cst = arith.constant dense<0.000000e+00> : vector<8x128xf32>
    %8 = tpu.matmul %7, %0, %cst {dimension_numbers = #tpu.dot_dimension_numbers<[1], [0], [0], [1], [0, 0, 1, 1], [], []>} : vector<8x128xf32>, vector<128x128xf32>, vector<8x128xf32> -> vector<8x128xf32>
    %9 = vector.broadcast %4 : vector<1x128xf32> to vector<8x128xf32>
    %10 = arith.addf %8, %9 : vector<8x128xf32>
    %11 = math.tanh %10 : vector<8x128xf32>
    %cst_9 = arith.constant dense<0.000000e+00> : vector<8x128xf32>
    %12 = tpu.matmul %11, %1, %cst_9 {dimension_numbers = #tpu.dot_dimension_numbers<[1], [0], [0], [1], [0, 0, 1, 1], [], []>} : vector<8x128xf32>, vector<128x128xf32>, vector<8x128xf32> -> vector<8x128xf32>
    %13 = vector.broadcast %5 : vector<1x128xf32> to vector<8x128xf32>
    %14 = arith.addf %12, %13 : vector<8x128xf32>
    %15 = math.tanh %14 : vector<8x128xf32>
    %cst_10 = arith.constant dense<0.000000e+00> : vector<8x128xf32>
    %16 = tpu.matmul %15, %2, %cst_10 {dimension_numbers = #tpu.dot_dimension_numbers<[1], [0], [0], [1], [0, 0, 1, 1], [], []>} : vector<8x128xf32>, vector<128x128xf32>, vector<8x128xf32> -> vector<8x128xf32>
    %17 = vector.broadcast %6 : vector<1x128xf32> to vector<8x128xf32>
    %18 = arith.addf %16, %17 : vector<8x128xf32>
    %cst_11 = arith.constant 0.000000e+00 : f32
    %19 = vector.broadcast %cst_11 : f32 to vector<8x128xf32>
    %cst_12 = arith.constant dense<0.000000e+00> : vector<8x128xf32>
    %20 = tpu.matmul %19, %3, %cst_12 {dimension_numbers = #tpu.dot_dimension_numbers<[1], [0], [0], [1], [0, 0, 1, 1], [], []>} : vector<8x128xf32>, vector<128x128xf32>, vector<8x128xf32> -> vector<8x128xf32>
    %21 = arith.addf %18, %20 : vector<8x128xf32>
    %22 = math.tanh %21 : vector<8x128xf32>
    %cst_13 = arith.constant dense<0.000000e+00> : vector<8x128xf32>
    %23 = tpu.matmul %22, %3, %cst_13 {dimension_numbers = #tpu.dot_dimension_numbers<[1], [0], [0], [1], [0, 0, 1, 1], [], []>} : vector<8x128xf32>, vector<128x128xf32>, vector<8x128xf32> -> vector<8x128xf32>
    %24 = arith.addf %18, %23 : vector<8x128xf32>
    %25 = math.tanh %24 : vector<8x128xf32>
    %cst_14 = arith.constant dense<0.000000e+00> : vector<8x128xf32>
    %26 = tpu.matmul %25, %3, %cst_14 {dimension_numbers = #tpu.dot_dimension_numbers<[1], [0], [0], [1], [0, 0, 1, 1], [], []>} : vector<8x128xf32>, vector<128x128xf32>, vector<8x128xf32> -> vector<8x128xf32>
    %27 = arith.addf %18, %26 : vector<8x128xf32>
    %28 = math.tanh %27 : vector<8x128xf32>
    %cst_15 = arith.constant dense<0.000000e+00> : vector<8x128xf32>
    %29 = tpu.matmul %28, %3, %cst_15 {dimension_numbers = #tpu.dot_dimension_numbers<[1], [0], [0], [1], [0, 0, 1, 1], [], []>} : vector<8x128xf32>, vector<128x128xf32>, vector<8x128xf32> -> vector<8x128xf32>
    %30 = arith.addf %18, %29 : vector<8x128xf32>
    %31 = math.tanh %30 : vector<8x128xf32>
    %cst_16 = arith.constant dense<0.000000e+00> : vector<8x128xf32>
    %32 = tpu.matmul %31, %3, %cst_16 {dimension_numbers = #tpu.dot_dimension_numbers<[1], [0], [0], [1], [0, 0, 1, 1], [], []>} : vector<8x128xf32>, vector<128x128xf32>, vector<8x128xf32> -> vector<8x128xf32>
    %33 = arith.addf %18, %32 : vector<8x128xf32>
    %34 = math.tanh %33 : vector<8x128xf32>
    %cst_17 = arith.constant dense<0.000000e+00> : vector<8x128xf32>
    %35 = tpu.matmul %34, %3, %cst_17 {dimension_numbers = #tpu.dot_dimension_numbers<[1], [0], [0], [1], [0, 0, 1, 1], [], []>} : vector<8x128xf32>, vector<128x128xf32>, vector<8x128xf32> -> vector<8x128xf32>
    %36 = arith.addf %18, %35 : vector<8x128xf32>
    %37 = math.tanh %36 : vector<8x128xf32>
    %cst_18 = arith.constant dense<0.000000e+00> : vector<8x128xf32>
    %38 = tpu.matmul %37, %3, %cst_18 {dimension_numbers = #tpu.dot_dimension_numbers<[1], [0], [0], [1], [0, 0, 1, 1], [], []>} : vector<8x128xf32>, vector<128x128xf32>, vector<8x128xf32> -> vector<8x128xf32>
    %39 = arith.addf %18, %38 : vector<8x128xf32>
    %40 = math.tanh %39 : vector<8x128xf32>
    %cst_19 = arith.constant dense<0.000000e+00> : vector<8x128xf32>
    %41 = tpu.matmul %40, %3, %cst_19 {dimension_numbers = #tpu.dot_dimension_numbers<[1], [0], [0], [1], [0, 0, 1, 1], [], []>} : vector<8x128xf32>, vector<128x128xf32>, vector<8x128xf32> -> vector<8x128xf32>
    %42 = arith.addf %18, %41 : vector<8x128xf32>
    %43 = math.tanh %42 : vector<8x128xf32>
    %44 = tpu.concatenate %22, %25, %28, %31, %34, %37, %40, %43 in 0 : vector<8x128xf32>, vector<8x128xf32>, vector<8x128xf32>, vector<8x128xf32>, vector<8x128xf32>, vector<8x128xf32>, vector<8x128xf32>, vector<8x128xf32> -> vector<64x128xf32>
    tpu.wait_dma2 semaphore(%arg5 : memref<!tpu.dma_semaphore, #tpu.memory_space<semaphore_mem>>) src(%arg2 : memref<136x512xf32, #tpu.memory_space<any>>) dst(%arg4 : memref<136x512xf32, #tpu.memory_space<vmem>>)
    %c0_20 = arith.constant 0 : index
    %c0_21 = arith.constant 0 : index
    %45 = vector.load %arg4[%c0_20, %c0_21] : memref<136x512xf32, #tpu.memory_space<vmem>>, vector<128x512xf32>
    %c128_22 = arith.constant 128 : index
    %c0_23 = arith.constant 0 : index
    %46 = vector.load %arg4[%c128_22, %c0_23] : memref<136x512xf32, #tpu.memory_space<vmem>>, vector<1x512xf32>
    %cst_24 = arith.constant dense<0.000000e+00> : vector<64x512xf32>
    %47 = tpu.matmul %44, %45, %cst_24 {dimension_numbers = #tpu.dot_dimension_numbers<[1], [0], [0], [1], [0, 0, 1, 1], [], []>} : vector<64x128xf32>, vector<128x512xf32>, vector<64x512xf32> -> vector<64x512xf32>
    %48 = tpu.iota {dimensions = array<i32: 1>} : vector<8x512xi32>
    %cst_25 = arith.constant 0.000000e+00 : f32
    %49 = vector.broadcast %cst_25 : f32 to vector<8x512xf32>
    %c0_i32 = arith.constant 0 : i32
    %50 = vector.broadcast %c0_i32 : i32 to vector<8x512xi32>
    %51 = arith.cmpi sge, %48, %50 : vector<8x512xi32>
    %c33_i32 = arith.constant 33 : i32
    %52 = vector.broadcast %c33_i32 : i32 to vector<8x512xi32>
    %53 = arith.cmpi slt, %48, %52 : vector<8x512xi32>
    %54 = arith.andi %51, %53 : vector<8x512xi1>
    %55 = vector.extract_strided_slice %47 {offsets = [0, 0], sizes = [8, 512], strides = [1, 1]} : vector<64x512xf32> to vector<8x512xf32>
    %cst_26 = arith.constant 0.000000e+00 : f32
    %56 = vector.broadcast %cst_26 : f32 to vector<8x512xf32>
    %57 = arith.select %54, %55, %56 : vector<8x512xi1>, vector<8x512xf32>
    %58 = arith.addf %49, %57 : vector<8x512xf32>
    %c33_i32_27 = arith.constant 33 : i32
    %59 = vector.broadcast %c33_i32_27 : i32 to vector<8x512xi32>
    %60 = arith.cmpi sge, %48, %59 : vector<8x512xi32>
    %c98_i32 = arith.constant 98 : i32
    %61 = vector.broadcast %c98_i32 : i32 to vector<8x512xi32>
    %62 = arith.cmpi slt, %48, %61 : vector<8x512xi32>
    %63 = arith.andi %60, %62 : vector<8x512xi1>
    %64 = vector.extract_strided_slice %47 {offsets = [8, 0], sizes = [8, 512], strides = [1, 1]} : vector<64x512xf32> to vector<8x512xf32>
    %cst_28 = arith.constant 0.000000e+00 : f32
    %65 = vector.broadcast %cst_28 : f32 to vector<8x512xf32>
    %66 = arith.select %63, %64, %65 : vector<8x512xi1>, vector<8x512xf32>
    %67 = arith.addf %58, %66 : vector<8x512xf32>
    %c98_i32_29 = arith.constant 98 : i32
    %68 = vector.broadcast %c98_i32_29 : i32 to vector<8x512xi32>
    %69 = arith.cmpi sge, %48, %68 : vector<8x512xi32>
    %c227_i32 = arith.constant 227 : i32
    %70 = vector.broadcast %c227_i32 : i32 to vector<8x512xi32>
    %71 = arith.cmpi slt, %48, %70 : vector<8x512xi32>
    %72 = arith.andi %69, %71 : vector<8x512xi1>
    %73 = vector.extract_strided_slice %47 {offsets = [16, 0], sizes = [8, 512], strides = [1, 1]} : vector<64x512xf32> to vector<8x512xf32>
    %cst_30 = arith.constant 0.000000e+00 : f32
    %74 = vector.broadcast %cst_30 : f32 to vector<8x512xf32>
    %75 = arith.select %72, %73, %74 : vector<8x512xi1>, vector<8x512xf32>
    %76 = arith.addf %67, %75 : vector<8x512xf32>
    %c227_i32_31 = arith.constant 227 : i32
    %77 = vector.broadcast %c227_i32_31 : i32 to vector<8x512xi32>
    %78 = arith.cmpi sge, %48, %77 : vector<8x512xi32>
    %c484_i32 = arith.constant 484 : i32
    %79 = vector.broadcast %c484_i32 : i32 to vector<8x512xi32>
    %80 = arith.cmpi slt, %48, %79 : vector<8x512xi32>
    %81 = arith.andi %78, %80 : vector<8x512xi1>
    %82 = vector.extract_strided_slice %47 {offsets = [24, 0], sizes = [8, 512], strides = [1, 1]} : vector<64x512xf32> to vector<8x512xf32>
    %cst_32 = arith.constant 0.000000e+00 : f32
    %83 = vector.broadcast %cst_32 : f32 to vector<8x512xf32>
    %84 = arith.select %81, %82, %83 : vector<8x512xi1>, vector<8x512xf32>
    %85 = arith.addf %76, %84 : vector<8x512xf32>
    %c484_i32_33 = arith.constant 484 : i32
    %86 = vector.broadcast %c484_i32_33 : i32 to vector<8x512xi32>
    %87 = arith.cmpi sge, %48, %86 : vector<8x512xi32>
    %c486_i32 = arith.constant 486 : i32
    %88 = vector.broadcast %c486_i32 : i32 to vector<8x512xi32>
    %89 = arith.cmpi slt, %48, %88 : vector<8x512xi32>
    %90 = arith.andi %87, %89 : vector<8x512xi1>
    %91 = vector.extract_strided_slice %47 {offsets = [32, 0], sizes = [8, 512], strides = [1, 1]} : vector<64x512xf32> to vector<8x512xf32>
    %cst_34 = arith.constant 0.000000e+00 : f32
    %92 = vector.broadcast %cst_34 : f32 to vector<8x512xf32>
    %93 = arith.select %90, %91, %92 : vector<8x512xi1>, vector<8x512xf32>
    %94 = arith.addf %85, %93 : vector<8x512xf32>
    %c486_i32_35 = arith.constant 486 : i32
    %95 = vector.broadcast %c486_i32_35 : i32 to vector<8x512xi32>
    %96 = arith.cmpi sge, %48, %95 : vector<8x512xi32>
    %c489_i32 = arith.constant 489 : i32
    %97 = vector.broadcast %c489_i32 : i32 to vector<8x512xi32>
    %98 = arith.cmpi slt, %48, %97 : vector<8x512xi32>
    %99 = arith.andi %96, %98 : vector<8x512xi1>
    %100 = vector.extract_strided_slice %47 {offsets = [40, 0], sizes = [8, 512], strides = [1, 1]} : vector<64x512xf32> to vector<8x512xf32>
    %cst_36 = arith.constant 0.000000e+00 : f32
    %101 = vector.broadcast %cst_36 : f32 to vector<8x512xf32>
    %102 = arith.select %99, %100, %101 : vector<8x512xi1>, vector<8x512xf32>
    %103 = arith.addf %94, %102 : vector<8x512xf32>
    %c489_i32_37 = arith.constant 489 : i32
    %104 = vector.broadcast %c489_i32_37 : i32 to vector<8x512xi32>
    %105 = arith.cmpi sge, %48, %104 : vector<8x512xi32>
    %c494_i32 = arith.constant 494 : i32
    %106 = vector.broadcast %c494_i32 : i32 to vector<8x512xi32>
    %107 = arith.cmpi slt, %48, %106 : vector<8x512xi32>
    %108 = arith.andi %105, %107 : vector<8x512xi1>
    %109 = vector.extract_strided_slice %47 {offsets = [48, 0], sizes = [8, 512], strides = [1, 1]} : vector<64x512xf32> to vector<8x512xf32>
    %cst_38 = arith.constant 0.000000e+00 : f32
    %110 = vector.broadcast %cst_38 : f32 to vector<8x512xf32>
    %111 = arith.select %108, %109, %110 : vector<8x512xi1>, vector<8x512xf32>
    %112 = arith.addf %103, %111 : vector<8x512xf32>
    %c494_i32_39 = arith.constant 494 : i32
    %113 = vector.broadcast %c494_i32_39 : i32 to vector<8x512xi32>
    %114 = arith.cmpi sge, %48, %113 : vector<8x512xi32>
    %c496_i32 = arith.constant 496 : i32
    %115 = vector.broadcast %c496_i32 : i32 to vector<8x512xi32>
    %116 = arith.cmpi slt, %48, %115 : vector<8x512xi32>
    %117 = arith.andi %114, %116 : vector<8x512xi1>
    %118 = vector.extract_strided_slice %47 {offsets = [56, 0], sizes = [8, 512], strides = [1, 1]} : vector<64x512xf32> to vector<8x512xf32>
    %cst_40 = arith.constant 0.000000e+00 : f32
    %119 = vector.broadcast %cst_40 : f32 to vector<8x512xf32>
    %120 = arith.select %117, %118, %119 : vector<8x512xi1>, vector<8x512xf32>
    %121 = arith.addf %112, %120 : vector<8x512xf32>
    %122 = vector.broadcast %46 : vector<1x512xf32> to vector<8x512xf32>
    %123 = arith.addf %121, %122 : vector<8x512xf32>
    %c0_41 = arith.constant 0 : index
    %c0_42 = arith.constant 0 : index
    %124 = vector.load %arg3[%c0_41, %c0_42] : memref<8x512xf32, #tpu.memory_space<vmem>>, vector<8x512xf32>
    tpu.vector_store %arg3[%c0_41, %c0_42], %123 {strides = array<i32>} : memref<8x512xf32, #tpu.memory_space<vmem>>, vector<8x512xf32>,
    return
  }
}

</mosaic_0001>

<bundles_post_ra>
// kernel: mapper_forward.1
= control target key start
LH: loop header
LB: loop body
LE: loop exit
PB: predicated region body
PF: predicated region fallthrough
CT: control target
= control target key end

     0   :  { %8 = vsyncpa [#allocation5], 0  ;;  %s874_s15 = smov [#allocation4]   ;;  %s875_s17 = smov 128   ;;  %s1181_s0 = inlined_call_operand.vmem [shape: f32[8,128], index: 0, kind: input, shape index: {}]   ;;  %s1182_s1 = inlined_call_operand.hbm [shape: f32[536,128], index: 1, kind: input, shape index: {}]   ;;  %s1183_s2 = inlined_call_operand.hbm [shape: f32[136,512], index: 2, kind: input, shape index: {}]   ;;  %s1184_s3 = inlined_call_operand.vmem [shape: f32[8,512], index: 3, kind: output, shape index: {}]  }
   0x1   :  { %s15_s14 = sshll.u32 %s1182_s1, 4  ;;  %s17_s16 = sshll.u32 %s874_s15, 4  ;;  %s16_s14 = int_to_ptr.hbm [resolvable:$true] %s15_s14  ;;  %s18_s16 = int_to_ptr.vmem [resolvable:$true] %s17_s16 }
   0x2   :  { %s876_s18 = smov 8  }
   0x3   :  { %23 = dma.hbm_to_vmem [thread:$0]  %s16_s14, 8576, %s18_s16, [#allocation5], %s875_s17, %s875_s17, %s876_s18  }
   0x4   :  { %870 = dma.done.wait [#allocation5], 8576  }
   0x5   :  { %871 = vsyncadd [#allocation5], 4294958720  ;;  %v56_v0 = vld [vmem:[#allocation4 + $0x78] sm:$0xff]  ;;  %v55_v1 = vld [vmem:[#allocation4 + $0x70] sm:$0xff]  ;;  %s35_s21 = sshll.u32 %s1183_s2, 4  ;;  %s878_s22 = smov [#allocation2]   ;;  %s36_s21 = int_to_ptr.hbm [resolvable:$true] %s35_s21 }
   0x6   :  { %110 = vmatpush.msra.mxu0 %v56_v0  ;;  %v54_v2 = vld [vmem:[#allocation4 + $0x68] sm:$0xff]  ;;  %v53_v3 = vld [vmem:[#allocation4 + $0x60] sm:$0xff]  ;;  %v72_v4 = vld [vmem:[#allocation4 + $0xf8] sm:$0xff]  ;;  %s37_s23 = sshll.u32 %s878_s22, 4  ;;  %s38_s23 = int_to_ptr.vmem [resolvable:$true] %s37_s23 }
   0x7   :  { %v52_v5 = vld [vmem:[#allocation4 + $0x58] sm:$0xff]  ;;  %132 = vmatpush.msra.mxu1 %v72_v4  ;;  %v71_v6 = vld [vmem:[#allocation4 + $0xf0] sm:$0xff]  ;;  %v70_v7 = vld [vmem:[#allocation4 + $0xe8] sm:$0xff]  ;;  %40 = dma.hbm_to_vmem [thread:$0]  %s36_s21, 8704, %s38_s23, [#allocation3] }
   0x8   :  { %111 = vmatpush.msra.mxu0 %v55_v1  ;;  %v51_v8 = vld [vmem:[#allocation4 + $0x50] sm:$0xff]  ;;  %v69_v9 = vld [vmem:[#allocation4 + $0xe0] sm:$0xff]  ;;  %v50_v10 = vld [vmem:[#allocation4 + $0x48] sm:$0xff] }
   0x9   :  { %133 = vmatpush.msra.mxu1 %v71_v6  ;;  %v68_v11 = vld [vmem:[#allocation4 + $0xd8] sm:$0xff]  ;;  %v49_v12 = vld [vmem:[#allocation4 + $0x40] sm:$0xff]  ;;  %v67_v13 = vld [vmem:[#allocation4 + $0xd0] sm:$0xff] }
   0xa   :  { %112 = vmatpush.msra.mxu0 %v54_v2  ;;  %v48_v14 = vld [vmem:[#allocation4 + $0x38] sm:$0xff]  ;;  %v66_v15 = vld [vmem:[#allocation4 + $0xc8] sm:$0xff]  ;;  %v47_v16 = vld [vmem:[#allocation4 + $0x30] sm:$0xff] }
   0xb   :  { %134 = vmatpush.msra.mxu1 %v70_v7  ;;  %v65_v17 = vld [vmem:[#allocation4 + $0xc0] sm:$0xff]  ;;  %v46_v18 = vld [vmem:[#allocation4 + $0x28] sm:$0xff]  ;;  %v64_v19 = vld [vmem:[#allocation4 + $0xb8] sm:$0xff] }
   0xc   :  { %113 = vmatpush.msra.mxu0 %v53_v3  ;;  %v45_v20 = vld [vmem:[#allocation4 + $0x20] sm:$0xff]  ;;  %v63_v21 = vld [vmem:[#allocation4 + $0xb0] sm:$0xff]  ;;  %v44_v22 = vld [vmem:[#allocation4 + $0x18] sm:$0xff] }
   0xd   :  { %135 = vmatpush.msra.mxu1 %v69_v9  ;;  %v62_v23 = vld [vmem:[#allocation4 + $0xa8] sm:$0xff]  ;;  %v43_v24 = vld [vmem:[#allocation4 + $0x10] sm:$0xff]  ;;  %v41_v26 = vld [vmem:[#allocation4] sm:$0xff] }
   0xe   :  { %114 = vmatpush.msra.mxu0 %v52_v5  ;;  %v42_v25 = vld [vmem:[#allocation4 + $0x8] sm:$0xff]  ;;  %v108_v27 = vld [vmem:[%s1181_s0] sm:$0xff]  ;;  %v60_v29 = vld [vmem:[#allocation4 + $0x98] sm:$0xff]  ;;  %v877_v5 = vmov 0.0  }
   0xf   :  { %136 = vmatpush.msra.mxu1 %v68_v11  ;;  %v61_v28 = vld [vmem:[#allocation4 + $0xa0] sm:$0xff]  ;;  %v59_v30 = vld [vmem:[#allocation4 + $0x90] sm:$0xff]  ;;  %v58_v31 = vld [vmem:[#allocation4 + $0x88] sm:$0xff] }
  0x10   :  { %115 = vmatpush.msra.mxu0 %v51_v8  ;;  %v57_v32 = vld [vmem:[#allocation4 + $0x80] sm:$0xff]  ;;  %v88_v33 = vld [vmem:[#allocation4 + $0x178] sm:$0xff]  ;;  %v87_v34 = vld [vmem:[#allocation4 + $0x170] sm:$0xff] }
  0x11   :  { %137 = vmatpush.msra.mxu1 %v67_v13  ;;  %v905_v35 = vld [vmem:[#allocation4 + $0x1f8] sm:$0xff]  ;;  %154 = vmatpush.msra.mxu2 %v88_v33  ;;  %v908_v36 = vld [vmem:[#allocation4 + $0x1f0] sm:$0xff]  ;;  %v86_v37 = vld [vmem:[#allocation4 + $0x168] sm:$0xff] }
  0x12   :  { %116 = vmatpush.msra.mxu0 %v50_v10  ;;  %174 = vmatpush.msra.mxu3 %v905_v35  ;;  %v910_v38 = vld [vmem:[#allocation4 + $0x1e8] sm:$0xff]  ;;  %v85_v39 = vld [vmem:[#allocation4 + $0x160] sm:$0xff]  ;;  %v84_v41 = vld [vmem:[#allocation4 + $0x158] sm:$0xff] }
  0x13   :  { %138 = vmatpush.msra.mxu1 %v66_v15  ;;  %155 = vmatpush.msra.mxu2 %v87_v34  ;;  %v915_v40 = vld [vmem:[#allocation4 + $0x1e0] sm:$0xff]  ;;  %v920_v42 = vld [vmem:[#allocation4 + $0x1d8] sm:$0xff]  ;;  %v83_v43 = vld [vmem:[#allocation4 + $0x150] sm:$0xff] }
  0x14   :  { %117 = vmatpush.msra.mxu0 %v49_v12  ;;  %175 = vmatpush.msra.mxu3 %v908_v36  ;;  %v925_v44 = vld [vmem:[#allocation4 + $0x1d0] sm:$0xff]  ;;  %v82_v45 = vld [vmem:[#allocation4 + $0x148] sm:$0xff]  ;;  %v81_v47 = vld [vmem:[#allocation4 + $0x140] sm:$0xff] }
  0x15   :  { %139 = vmatpush.msra.mxu1 %v65_v17  ;;  %156 = vmatpush.msra.mxu2 %v86_v37  ;;  %v930_v46 = vld [vmem:[#allocation4 + $0x1c8] sm:$0xff]  ;;  %v935_v48 = vld [vmem:[#allocation4 + $0x1c0] sm:$0xff]  ;;  %v80_v49 = vld [vmem:[#allocation4 + $0x138] sm:$0xff] }
  0x16   :  { %118 = vmatpush.msra.mxu0 %v48_v14  ;;  %176 = vmatpush.msra.mxu3 %v910_v38  ;;  %v940_v50 = vld [vmem:[#allocation4 + $0x1b8] sm:$0xff]  ;;  %v79_v51 = vld [vmem:[#allocation4 + $0x130] sm:$0xff]  ;;  %v78_v53 = vld [vmem:[#allocation4 + $0x128] sm:$0xff] }
  0x17   :  { %140 = vmatpush.msra.mxu1 %v64_v19  ;;  %157 = vmatpush.msra.mxu2 %v85_v39  ;;  %v945_v52 = vld [vmem:[#allocation4 + $0x1b0] sm:$0xff]  ;;  %v799_v54 = vld [vmem:[#allocation4 + $0x200] ss:$0 sm:$0xff]  ;;  %v955_v59 = vld [vmem:[#allocation4 + $0x1a8] sm:$0xff] }
  0x18   :  { %119 = vmatpush.msra.mxu0 %v47_v16  ;;  %177 = vmatpush.msra.mxu3 %v915_v40  ;;  %v77_v58 = vld [vmem:[#allocation4 + $0x120] sm:$0xff]  ;;  %v76_v60 = vld [vmem:[#allocation4 + $0x118] sm:$0xff]  ;;  %v75_v62 = vld [vmem:[#allocation4 + $0x110] sm:$0xff] }
  0x19   :  { %141 = vmatpush.msra.mxu1 %v63_v21  ;;  %158 = vmatpush.msra.mxu2 %v84_v41  ;;  %v958_v61 = vld [vmem:[#allocation4 + $0x1a0] sm:$0xff]  ;;  %v963_v63 = vld [vmem:[#allocation4 + $0x198] sm:$0xff]  ;;  %v74_v0 = vld [vmem:[#allocation4 + $0x108] sm:$0xff] }
  0x1a   :  { %120 = vmatpush.msra.mxu0 %v46_v18  ;;  %178 = vmatpush.msra.mxu3 %v920_v42  ;;  %v965_v1 = vld [vmem:[#allocation4 + $0x190] sm:$0xff]  ;;  %v73_v2 = vld [vmem:[#allocation4 + $0x100] sm:$0xff]  ;;  %v970_v3 = vld [vmem:[#allocation4 + $0x188] sm:$0xff] }
  0x1b   :  { %142 = vmatpush.msra.mxu1 %v62_v23  ;;  %159 = vmatpush.msra.mxu2 %v83_v43  ;;  %v978_v4 = vld [vmem:[#allocation4 + $0x180] sm:$0xff]  ;;  %v800_v6 = vld [vmem:[#allocation4 + $0x208] ss:$0 sm:$0xff]  ;;  %v801_v10 = vld [vmem:[#allocation4 + $0x210] ss:$0 sm:$0xff] }
  0x1c   :  { %121 = vmatpush.msra.mxu0 %v45_v20  ;;  %179 = vmatpush.msra.mxu3 %v925_v44 }
  0x1d   :  { %143 = vmatpush.msra.mxu1 %v61_v28  ;;  %160 = vmatpush.msra.mxu2 %v82_v45 }
  0x1e   :  { %122 = vmatpush.msra.mxu0 %v44_v22  ;;  %180 = vmatpush.msra.mxu3 %v930_v46 }
  0x1f   :  { %144 = vmatpush.msra.mxu1 %v60_v29  ;;  %161 = vmatpush.msra.mxu2 %v81_v47 }
  0x20   :  { %123 = vmatpush.msra.mxu0 %v43_v24  ;;  %181 = vmatpush.msra.mxu3 %v935_v48 }
  0x21   :  { %145 = vmatpush.msra.mxu1 %v59_v30  ;;  %162 = vmatpush.msra.mxu2 %v80_v49 }
  0x22   :  { %124 = vmatpush.msra.mxu0 %v42_v25  ;;  %182 = vmatpush.msra.mxu3 %v940_v50 }
  0x23   :  { %146 = vmatpush.msra.mxu1 %v58_v31  ;;  %163 = vmatpush.msra.mxu2 %v79_v51 }
  0x24   :  { %125 = vmatpush.msra.mxu0 %v41_v26  ;;  %183 = vmatpush.msra.mxu3 %v945_v52 }
  0x25   :  { %126 = vmatmul.f32.vlgmr.msra.gmra.mxu0 %v108_v27  ;;  %147 = vmatpush.msra.mxu1 %v57_v32 }
  0x26   :  { %196 = vmatpush.msrb.mxu0 %v905_v35  ;;  %164 = vmatpush.msra.mxu2 %v78_v53 }
  0x27   :  { %218 = vmatpush.msrb.mxu1 %v905_v35  ;;  %184 = vmatpush.msra.mxu3 %v955_v59 }
  0x28   :  { %197 = vmatpush.msrb.mxu0 %v908_v36  ;;  %165 = vmatpush.msra.mxu2 %v77_v58 }
  0x29   :  { %219 = vmatpush.msrb.mxu1 %v908_v36  ;;  %185 = vmatpush.msra.mxu3 %v958_v61 }
  0x2a   :  { %198 = vmatpush.msrb.mxu0 %v910_v38  ;;  %166 = vmatpush.msra.mxu2 %v76_v60 }
  0x2b   :  { %220 = vmatpush.msrb.mxu1 %v910_v38  ;;  %186 = vmatpush.msra.mxu3 %v963_v63 }
  0x2c   :  { %199 = vmatpush.msrb.mxu0 %v915_v40  ;;  %167 = vmatpush.msra.mxu2 %v75_v62 }
  0x2d   :  { %221 = vmatpush.msrb.mxu1 %v915_v40  ;;  %187 = vmatpush.msra.mxu3 %v965_v1 }
  0x2e   :  { %200 = vmatpush.msrb.mxu0 %v920_v42  ;;  %168 = vmatpush.msra.mxu2 %v74_v0 }
  0x2f   :  { %222 = vmatpush.msrb.mxu1 %v920_v42  ;;  %188 = vmatpush.msra.mxu3 %v970_v3 }
  0x30   :  { %201 = vmatpush.msrb.mxu0 %v925_v44  ;;  %169 = vmatpush.msra.mxu2 %v73_v2 }
  0x31   :  { %223 = vmatpush.msrb.mxu1 %v925_v44  ;;  %189 = vmatpush.msra.mxu3 %v978_v4 }
  0x32   :  { %202 = vmatpush.msrb.mxu0 %v930_v46  ;;  %240 = vmatpush.msrb.mxu2 %v905_v35 }
  0x33   :  { %224 = vmatpush.msrb.mxu1 %v930_v46  ;;  %190 = vmatmul.f32.vlgmr.msra.gmra.mxu3 %v877_v5 }
  0x34   :  { %203 = vmatpush.msrb.mxu0 %v935_v48  ;;  %241 = vmatpush.msrb.mxu2 %v908_v36 }
  0x35   :  { %225 = vmatpush.msrb.mxu1 %v935_v48  ;;  %262 = vmatpush.msrb.mxu3 %v905_v35 }
  0x36   :  { %204 = vmatpush.msrb.mxu0 %v940_v50  ;;  %242 = vmatpush.msrb.mxu2 %v910_v38 }
  0x37   :  { %226 = vmatpush.msrb.mxu1 %v940_v50  ;;  %263 = vmatpush.msrb.mxu3 %v908_v36 }
  0x38   :  { %205 = vmatpush.msrb.mxu0 %v945_v52  ;;  %243 = vmatpush.msrb.mxu2 %v915_v40 }
  0x39   :  { %227 = vmatpush.msrb.mxu1 %v945_v52  ;;  %264 = vmatpush.msrb.mxu3 %v910_v38 }
  0x3a   :  { %206 = vmatpush.msrb.mxu0 %v955_v59  ;;  %244 = vmatpush.msrb.mxu2 %v920_v42 }
  0x3b   :  { %228 = vmatpush.msrb.mxu1 %v955_v59  ;;  %265 = vmatpush.msrb.mxu3 %v915_v40 }
  0x3c   :  { %207 = vmatpush.msrb.mxu0 %v958_v61  ;;  %245 = vmatpush.msrb.mxu2 %v925_v44 }
  0x3d   :  { %229 = vmatpush.msrb.mxu1 %v958_v61  ;;  %266 = vmatpush.msrb.mxu3 %v920_v42 }
  0x3e   :  { %208 = vmatpush.msrb.mxu0 %v963_v63  ;;  %246 = vmatpush.msrb.mxu2 %v930_v46 }
  0x3f   :  { %230 = vmatpush.msrb.mxu1 %v963_v63  ;;  %267 = vmatpush.msrb.mxu3 %v925_v44 }
  0x40   :  { %209 = vmatpush.msrb.mxu0 %v965_v1  ;;  %247 = vmatpush.msrb.mxu2 %v935_v48 }
  0x41   :  { %231 = vmatpush.msrb.mxu1 %v965_v1  ;;  %268 = vmatpush.msrb.mxu3 %v930_v46 }
  0x42   :  { %210 = vmatpush.msrb.mxu0 %v970_v3  ;;  %248 = vmatpush.msrb.mxu2 %v940_v50 }
  0x43   :  { %232 = vmatpush.msrb.mxu1 %v970_v3  ;;  %269 = vmatpush.msrb.mxu3 %v935_v48 }
  0x44   :  { %211 = vmatpush.msrb.mxu0 %v978_v4  ;;  %249 = vmatpush.msrb.mxu2 %v945_v52 }
  0x45   :  { %233 = vmatpush.msrb.mxu1 %v978_v4  ;;  %270 = vmatpush.msrb.mxu3 %v940_v50 }
  0x46   :  { %284 = vmatpush.msra.mxu0 %v905_v35  ;;  %250 = vmatpush.msrb.mxu2 %v955_v59 }
  0x47   :  { %271 = vmatpush.msrb.mxu3 %v945_v52 }
  0x48   :  { %285 = vmatpush.msra.mxu0 %v908_v36  ;;  %251 = vmatpush.msrb.mxu2 %v958_v61 }
  0x49   :  { %272 = vmatpush.msrb.mxu3 %v955_v59 }
  0x4a   :  { %286 = vmatpush.msra.mxu0 %v910_v38  ;;  %252 = vmatpush.msrb.mxu2 %v963_v63 }
  0x4b   :  { %273 = vmatpush.msrb.mxu3 %v958_v61 }
  0x4c   :  { %287 = vmatpush.msra.mxu0 %v915_v40  ;;  %253 = vmatpush.msrb.mxu2 %v965_v1 }
  0x4d   :  { %274 = vmatpush.msrb.mxu3 %v963_v63 }
  0x4e   :  { %288 = vmatpush.msra.mxu0 %v920_v42  ;;  %254 = vmatpush.msrb.mxu2 %v970_v3 }
  0x4f   :  { %275 = vmatpush.msrb.mxu3 %v965_v1 }
  0x50   :  { %289 = vmatpush.msra.mxu0 %v925_v44  ;;  %255 = vmatpush.msrb.mxu2 %v978_v4 }
  0x51   :  { %276 = vmatpush.msrb.mxu3 %v970_v3 }
  0x52   :  { %290 = vmatpush.msra.mxu0 %v930_v46 }
  0x53   :  { %277 = vmatpush.msrb.mxu3 %v978_v4 }
  0x54   :  { %291 = vmatpush.msra.mxu0 %v935_v48 }
  0x56   :  { %292 = vmatpush.msra.mxu0 %v940_v50 }
  0x58   :  { %293 = vmatpush.msra.mxu0 %v945_v52 }
  0x5a   :  { %294 = vmatpush.msra.mxu0 %v955_v59 }
  0x5c   :  { %295 = vmatpush.msra.mxu0 %v958_v61 }
  0x5e   :  { %296 = vmatpush.msra.mxu0 %v963_v63 }
  0x60   :  { %297 = vmatpush.msra.mxu0 %v965_v1 }
  0x62   :  { %298 = vmatpush.msra.mxu0 %v970_v3 }
  0x64   :  { %299 = vmatpush.msra.mxu0 %v978_v4 }
  0xa2   :  { %v127_v55 = vpop.f32.mrf.mxu0 }
  0xa3   :  { %v128_v56 = vadd.f32 %v799_v54, %v127_v55 }
  0xa5   :  { %802 = vtanh.f32 %v128_v56 }
  0xab   :  { %v803_v57 = vpop.eup %802 }
  0xac   :  { %148 = vmatmul.f32.vlgmr.msra.gmra.mxu1 %v803_v57 }
  0xad   :  { %306 = vmatpush.msra.mxu1 %v905_v35 }
  0xaf   :  { %307 = vmatpush.msra.mxu1 %v908_v36 }
  0xb1   :  { %308 = vmatpush.msra.mxu1 %v910_v38 }
  0xb3   :  { %309 = vmatpush.msra.mxu1 %v915_v40 }
  0xb5   :  { %310 = vmatpush.msra.mxu1 %v920_v42 }
  0xb6   :  { %v191_v12 = vpop.f32.mrf.mxu3 }
  0xb7   :  { %311 = vmatpush.msra.mxu1 %v925_v44 }
  0xb9   :  { %312 = vmatpush.msra.mxu1 %v930_v46 }
  0xbb   :  { %313 = vmatpush.msra.mxu1 %v935_v48 }
  0xbd   :  { %314 = vmatpush.msra.mxu1 %v940_v50 }
  0xbf   :  { %315 = vmatpush.msra.mxu1 %v945_v52 }
  0xc1   :  { %316 = vmatpush.msra.mxu1 %v955_v59 }
  0xc3   :  { %317 = vmatpush.msra.mxu1 %v958_v61 }
  0xc5   :  { %318 = vmatpush.msra.mxu1 %v963_v63 }
  0xc7   :  { %319 = vmatpush.msra.mxu1 %v965_v1 }
  0xc9   :  { %320 = vmatpush.msra.mxu1 %v970_v3 }
  0xcb   :  { %321 = vmatpush.msra.mxu1 %v978_v4 }
 0x129   :  { %v149_v7 = vpop.f32.mrf.mxu1 }
 0x12a   :  { %v150_v8 = vadd.f32 %v800_v6, %v149_v7 }
 0x12c   :  { %804 = vtanh.f32 %v150_v8 }
 0x132   :  { %v805_v9 = vpop.eup %804 }
 0x133   :  { %170 = vmatmul.f32.vlgmr.msra.gmra.mxu2 %v805_v9 }
 0x134   :  { %328 = vmatpush.msra.mxu2 %v905_v35 }
 0x136   :  { %329 = vmatpush.msra.mxu2 %v908_v36 }
 0x138   :  { %330 = vmatpush.msra.mxu2 %v910_v38 }
 0x13a   :  { %331 = vmatpush.msra.mxu2 %v915_v40 }
 0x13c   :  { %332 = vmatpush.msra.mxu2 %v920_v42 }
 0x13e   :  { %333 = vmatpush.msra.mxu2 %v925_v44 }
 0x140   :  { %334 = vmatpush.msra.mxu2 %v930_v46 }
 0x142   :  { %335 = vmatpush.msra.mxu2 %v935_v48 }
 0x144   :  { %336 = vmatpush.msra.mxu2 %v940_v50 }
 0x146   :  { %337 = vmatpush.msra.mxu2 %v945_v52 }
 0x148   :  { %338 = vmatpush.msra.mxu2 %v955_v59 }
 0x14a   :  { %339 = vmatpush.msra.mxu2 %v958_v61 }
 0x14c   :  { %340 = vmatpush.msra.mxu2 %v963_v63 }
 0x14e   :  { %341 = vmatpush.msra.mxu2 %v965_v1 }
 0x150   :  { %342 = vmatpush.msra.mxu2 %v970_v3 }
 0x152   :  { %343 = vmatpush.msra.mxu2 %v978_v4 }
 0x1b6   :  { %v171_v11 = vpop.f32.mrf.mxu2 }
 0x1b7   :  { %v172_v13 = vadd.f32 %v801_v10, %v171_v11 }
 0x1b9   :  { %v194_v14 = vadd.f32 %v191_v12, %v172_v13 }
 0x1bb   :  { %806 = vtanh.f32 %v194_v14 }
 0x1c1   :  { %v1065_v15 = vpop.eup %806 }
 0x1c2   :  { %212 = vmatmul.f32.vlgmr.msrb.gmra.mxu0 %v1065_v15 }
 0x23f   :  { %v213_v16 = vpop.f32.mrf.mxu0 }
 0x240   :  { %v216_v17 = vadd.f32 %v213_v16, %v172_v13 }
 0x242   :  { %808 = vtanh.f32 %v216_v17 }
 0x248   :  { %v1068_v18 = vpop.eup %808 }
 0x249   :  { %234 = vmatmul.f32.vlgmr.msrb.gmra.mxu1 %v1068_v18 }
 0x2c6   :  { %v235_v19 = vpop.f32.mrf.mxu1 }
 0x2c7   :  { %v238_v20 = vadd.f32 %v235_v19, %v172_v13 }
 0x2c9   :  { %810 = vtanh.f32 %v238_v20 }
 0x2cf   :  { %v1071_v21 = vpop.eup %810 }
 0x2d0   :  { %256 = vmatmul.f32.vlgmr.msrb.gmra.mxu2 %v1071_v21 }
 0x353   :  { %v257_v22 = vpop.f32.mrf.mxu2 }
 0x354   :  { %v260_v23 = vadd.f32 %v257_v22, %v172_v13 }
 0x356   :  { %812 = vtanh.f32 %v260_v23 }
 0x35c   :  { %v1074_v24 = vpop.eup %812 }
 0x35d   :  { %278 = vmatmul.f32.vlgmr.msrb.gmra.mxu3 %v1074_v24 }
 0x3e0   :  { %v279_v25 = vpop.f32.mrf.mxu3 }
 0x3e1   :  { %v282_v26 = vadd.f32 %v279_v25, %v172_v13 }
 0x3e3   :  { %814 = vtanh.f32 %v282_v26 }
 0x3e9   :  { %v1077_v27 = vpop.eup %814 }
 0x3ea   :  { %300 = vmatmul.f32.vlgmr.msra.gmra.mxu0 %v1077_v27 }
 0x467   :  { %v301_v28 = vpop.f32.mrf.mxu0 }
 0x468   :  { %v304_v29 = vadd.f32 %v301_v28, %v172_v13 }
 0x46a   :  { %816 = vtanh.f32 %v304_v29 }
 0x470   :  { %v1080_v30 = vpop.eup %816 }
 0x471   :  { %322 = vmatmul.f32.vlgmr.msra.gmra.mxu1 %v1080_v30 }
 0x4ee   :  { %v323_v31 = vpop.f32.mrf.mxu1 }
 0x4ef   :  { %v326_v32 = vadd.f32 %v323_v31, %v172_v13 }
 0x4f1   :  { %818 = vtanh.f32 %v326_v32 }
 0x4f7   :  { %v1083_v33 = vpop.eup %818 }
 0x4f8   :  { %344 = vmatmul.f32.vlgmr.msra.gmra.mxu2 %v1083_v33 }
 0x57b   :  { %v345_v34 = vpop.f32.mrf.mxu2 }
 0x57c   :  { %v348_v35 = vadd.f32 %v345_v34, %v172_v13 }
 0x57e   :  { %820 = vtanh.f32 %v348_v35 }
 0x584   :  { %v1089_v36 = vpop.eup %820 }
 0x585   :  { %872 = dma.done.wait [#allocation3], 8704 }
 0x586   :  { %873 = vsyncadd [#allocation3], 4294958592  ;;  %v414_v37 = vld [vmem:[#allocation2 + $0x1e0] sm:$0xff]  ;;  %v417_v38 = vld [vmem:[#allocation2 + $0x1f8] sm:$0xff] }
 0x587   :  { %v410_v39 = vld [vmem:[#allocation2 + $0x1c0] sm:$0xff]  ;;  %420 = vmatpush.msra.mxu3 %v414_v37  ;;  %543 = vmatpush.msrb.mxu2 %v417_v38  ;;  %v413_v40 = vld [vmem:[#allocation2 + $0x1d8] sm:$0xff]  ;;  %v1091_v46 = vld [vmem:[#allocation2 + $0x1e8] sm:$0xff] }
 0x588   :  { %v406_v41 = vld [vmem:[#allocation2 + $0x1a0] sm:$0xff]  ;;  %v409_v42 = vld [vmem:[#allocation2 + $0x1b8] sm:$0xff]  ;;  %v416_v47 = vld [vmem:[#allocation2 + $0x1f0] sm:$0xff]  ;;  %461 = vmatpush.msrb.mxu0 %v1091_v46 }
 0x589   :  { %421 = vmatpush.msra.mxu3 %v410_v39  ;;  %544 = vmatpush.msrb.mxu2 %v413_v40  ;;  %v402_v43 = vld [vmem:[#allocation2 + $0x180] sm:$0xff]  ;;  %v405_v44 = vld [vmem:[#allocation2 + $0x198] sm:$0xff]  ;;  %v1094_v49 = vld [vmem:[#allocation2 + $0x1c8] sm:$0xff] }
 0x58a   :  { %v398_v45 = vld [vmem:[#allocation2 + $0x160] sm:$0xff]  ;;  %v401_v48 = vld [vmem:[#allocation2 + $0x178] sm:$0xff]  ;;  %502 = vmatpush.msrb.mxu1 %v416_v47  ;;  %v412_v50 = vld [vmem:[#allocation2 + $0x1d0] sm:$0xff]  ;;  %462 = vmatpush.msrb.mxu0 %v1094_v49 }
 0x58b   :  { %422 = vmatpush.msra.mxu3 %v406_v41  ;;  %545 = vmatpush.msrb.mxu2 %v409_v42  ;;  %v1096_v51 = vld [vmem:[#allocation2 + $0x1a8] sm:$0xff]  ;;  %v394_v52 = vld [vmem:[#allocation2 + $0x140] sm:$0xff]  ;;  %v397_v53 = vld [vmem:[#allocation2 + $0x158] sm:$0xff] }
 0x58c   :  { %503 = vmatpush.msrb.mxu1 %v412_v50  ;;  %v408_v54 = vld [vmem:[#allocation2 + $0x1b0] sm:$0xff]  ;;  %v1099_v55 = vld [vmem:[#allocation2 + $0x188] sm:$0xff]  ;;  %v390_v57 = vld [vmem:[#allocation2 + $0x120] sm:$0xff]  ;;  %463 = vmatpush.msrb.mxu0 %v1096_v51 }
 0x58d   :  { %423 = vmatpush.msra.mxu3 %v402_v43  ;;  %546 = vmatpush.msrb.mxu2 %v405_v44  ;;  %v404_v56 = vld [vmem:[#allocation2 + $0x190] sm:$0xff]  ;;  %v393_v58 = vld [vmem:[#allocation2 + $0x138] sm:$0xff]  ;;  %v1102_v59 = vld [vmem:[#allocation2 + $0x168] sm:$0xff] }
 0x58e   :  { %504 = vmatpush.msrb.mxu1 %v408_v54  ;;  %v400_v60 = vld [vmem:[#allocation2 + $0x170] sm:$0xff]  ;;  %v386_v61 = vld [vmem:[#allocation2 + $0x100] sm:$0xff]  ;;  %v389_v62 = vld [vmem:[#allocation2 + $0x118] sm:$0xff]  ;;  %464 = vmatpush.msrb.mxu0 %v1099_v55 }
 0x58f   :  { %424 = vmatpush.msra.mxu3 %v398_v45  ;;  %547 = vmatpush.msrb.mxu2 %v401_v48  ;;  %v1105_v63 = vld [vmem:[#allocation2 + $0x148] sm:$0xff]  ;;  %v396_v0 = vld [vmem:[#allocation2 + $0x150] sm:$0xff]  ;;  %v382_v1 = vld [vmem:[#allocation2 + $0xe0] sm:$0xff] }
 0x590   :  { %505 = vmatpush.msrb.mxu1 %v404_v56  ;;  %v385_v2 = vld [vmem:[#allocation2 + $0xf8] sm:$0xff]  ;;  %465 = vmatpush.msrb.mxu0 %v1102_v59  ;;  %v1108_v3 = vld [vmem:[#allocation2 + $0x128] sm:$0xff]  ;;  %v392_v4 = vld [vmem:[#allocation2 + $0x130] sm:$0xff] }
 0x591   :  { %425 = vmatpush.msra.mxu3 %v394_v52  ;;  %548 = vmatpush.msrb.mxu2 %v397_v53  ;;  %v378_v5 = vld [vmem:[#allocation2 + $0xc0] sm:$0xff]  ;;  %v381_v6 = vld [vmem:[#allocation2 + $0xd8] sm:$0xff]  ;;  %v1111_v7 = vld [vmem:[#allocation2 + $0x108] sm:$0xff] }
 0x592   :  { %506 = vmatpush.msrb.mxu1 %v400_v60  ;;  %466 = vmatpush.msrb.mxu0 %v1105_v63  ;;  %v388_v8 = vld [vmem:[#allocation2 + $0x110] sm:$0xff]  ;;  %v374_v9 = vld [vmem:[#allocation2 + $0xa0] sm:$0xff]  ;;  %v377_v10 = vld [vmem:[#allocation2 + $0xb8] sm:$0xff] }
 0x593   :  { %426 = vmatpush.msra.mxu3 %v390_v57  ;;  %549 = vmatpush.msrb.mxu2 %v393_v58  ;;  %v1114_v11 = vld [vmem:[#allocation2 + $0xe8] sm:$0xff]  ;;  %v384_v12 = vld [vmem:[#allocation2 + $0xf0] sm:$0xff]  ;;  %v370_v13 = vld [vmem:[#allocation2 + $0x80] sm:$0xff] }
 0x594   :  { %507 = vmatpush.msrb.mxu1 %v396_v0  ;;  %467 = vmatpush.msrb.mxu0 %v1108_v3  ;;  %v373_v14 = vld [vmem:[#allocation2 + $0x98] sm:$0xff]  ;;  %v1117_v16 = vld [vmem:[#allocation2 + $0xc8] sm:$0xff]  ;;  %v380_v17 = vld [vmem:[#allocation2 + $0xd0] sm:$0xff] }
 0x595   :  { %427 = vmatpush.msra.mxu3 %v386_v61  ;;  %550 = vmatpush.msrb.mxu2 %v389_v62  ;;  %v366_v19 = vld [vmem:[#allocation2 + $0x60] sm:$0xff]  ;;  %v369_v20 = vld [vmem:[#allocation2 + $0x78] sm:$0xff]  ;;  %v375_v22 = vld [vmem:[#allocation2 + $0xa8] sm:$0xff] }
 0x596   :  { %508 = vmatpush.msrb.mxu1 %v392_v4  ;;  %468 = vmatpush.msrb.mxu0 %v1111_v7  ;;  %v376_v23 = vld [vmem:[#allocation2 + $0xb0] sm:$0xff]  ;;  %v362_v25 = vld [vmem:[#allocation2 + $0x40] sm:$0xff]  ;;  %v365_v26 = vld [vmem:[#allocation2 + $0x58] sm:$0xff] }
 0x597   :  { %428 = vmatpush.msra.mxu3 %v382_v1  ;;  %551 = vmatpush.msrb.mxu2 %v385_v2  ;;  %v371_v28 = vld [vmem:[#allocation2 + $0x88] sm:$0xff]  ;;  %v372_v29 = vld [vmem:[#allocation2 + $0x90] sm:$0xff]  ;;  %v358_v31 = vld [vmem:[#allocation2 + $0x20] sm:$0xff] }
 0x598   :  { %509 = vmatpush.msrb.mxu1 %v388_v8  ;;  %469 = vmatpush.msrb.mxu0 %v1114_v11  ;;  %v361_v32 = vld [vmem:[#allocation2 + $0x38] sm:$0xff]  ;;  %v367_v34 = vld [vmem:[#allocation2 + $0x68] sm:$0xff]  ;;  %v368_v35 = vld [vmem:[#allocation2 + $0x70] sm:$0xff] }
 0x599   :  { %429 = vmatpush.msra.mxu3 %v378_v5  ;;  %552 = vmatpush.msrb.mxu2 %v381_v6  ;;  %v354_v37 = vld [vmem:[#allocation2] sm:$0xff]  ;;  %v357_v38 = vld [vmem:[#allocation2 + $0x18] sm:$0xff]  ;;  %v363_v39 = vld [vmem:[#allocation2 + $0x48] sm:$0xff] }
 0x59a   :  { %510 = vmatpush.msrb.mxu1 %v384_v12  ;;  %470 = vmatpush.msrb.mxu0 %v1117_v16  ;;  %v364_v40 = vld [vmem:[#allocation2 + $0x50] sm:$0xff]  ;;  %v359_v41 = vld [vmem:[#allocation2 + $0x28] sm:$0xff] }
 0x59b   :  { %430 = vmatpush.msra.mxu3 %v374_v9  ;;  %553 = vmatpush.msrb.mxu2 %v377_v10  ;;  %v360_v42 = vld [vmem:[#allocation2 + $0x30] sm:$0xff]  ;;  %v355_v43 = vld [vmem:[#allocation2 + $0x8] sm:$0xff] }
 0x59c   :  { %511 = vmatpush.msrb.mxu1 %v380_v17  ;;  %471 = vmatpush.msrb.mxu0 %v375_v22  ;;  %v356_v44 = vld [vmem:[#allocation2 + $0x10] sm:$0xff] }
 0x59d   :  { %431 = vmatpush.msra.mxu3 %v370_v13  ;;  %554 = vmatpush.msrb.mxu2 %v373_v14 }
 0x59e   :  { %512 = vmatpush.msrb.mxu1 %v376_v23  ;;  %472 = vmatpush.msrb.mxu0 %v371_v28 }
 0x59f   :  { %432 = vmatpush.msra.mxu3 %v366_v19  ;;  %555 = vmatpush.msrb.mxu2 %v369_v20 }
 0x5a0   :  { %513 = vmatpush.msrb.mxu1 %v372_v29  ;;  %473 = vmatpush.msrb.mxu0 %v367_v34 }
 0x5a1   :  { %433 = vmatpush.msra.mxu3 %v362_v25  ;;  %556 = vmatpush.msrb.mxu2 %v365_v26 }
 0x5a2   :  { %514 = vmatpush.msrb.mxu1 %v368_v35  ;;  %474 = vmatpush.msrb.mxu0 %v363_v39 }
 0x5a3   :  { %434 = vmatpush.msra.mxu3 %v358_v31  ;;  %557 = vmatpush.msrb.mxu2 %v361_v32 }
 0x5a4   :  { %515 = vmatpush.msrb.mxu1 %v364_v40  ;;  %475 = vmatpush.msrb.mxu0 %v359_v41 }
 0x5a5   :  { %435 = vmatpush.msra.mxu3 %v354_v37  ;;  %558 = vmatpush.msrb.mxu2 %v357_v38 }
 0x5a6   :  { %436 = vmatmul.f32.vlgmr.msra.gmra.mxu3 %v1065_v15  ;;  %559 = vmatmul.f32.vlgmr.msrb.gmra.mxu2 %v1065_v15 }
 0x5a7   :  { %778 = vmatpush.msrb.mxu3 %v1091_v46  ;;  %516 = vmatpush.msrb.mxu1 %v360_v42 }
 0x5a8   :  { %476 = vmatpush.msrb.mxu0 %v355_v43 }
 0x5a9   :  { %779 = vmatpush.msrb.mxu3 %v1094_v49  ;;  %517 = vmatpush.msrb.mxu1 %v356_v44  ;;  %v1163_v49 = vld [vmem:[#allocation2 + $0x200] ss:$8 sm:$0xf] }
 0x5aa   :  { %477 = vmatmul.f32.vlgmr.msrb.gmra.mxu0 %v1065_v15  ;;  %518 = vmatmul.f32.vlgmr.msrb.gmra.mxu1 %v1065_v15  ;;  %v750_v52 = vperm.slane %v1163_v49, 0  ;;  %v752_v60 = vperm.slane %v1163_v49, 2  ;;  %v751_v1 = vperm.slane %v1163_v49, 1  ;;  %v753_v37 = vperm.slane %v1163_v49, 3 }
 0x5ab   :  { %780 = vmatpush.msrb.mxu3 %v1096_v51 }
 0x5ad   :  { %781 = vmatpush.msrb.mxu3 %v1099_v55 }
 0x5ae   :  { %439 = vmatmul.f32.gmra.mxu3 %v1068_v18  ;;  %562 = vmatmul.f32.gmra.mxu2 %v1068_v18 }
 0x5af   :  { %782 = vmatpush.msrb.mxu3 %v1102_v59 }
 0x5b1   :  { %783 = vmatpush.msrb.mxu3 %v1105_v63 }
 0x5b2   :  { %480 = vmatmul.f32.gmra.mxu0 %v1068_v18  ;;  %521 = vmatmul.f32.gmra.mxu1 %v1068_v18 }
 0x5b3   :  { %784 = vmatpush.msrb.mxu3 %v1108_v3 }
 0x5b5   :  { %785 = vmatpush.msrb.mxu3 %v1111_v7 }
 0x5b6   :  { %442 = vmatmul.f32.gmra.mxu3 %v1071_v21  ;;  %565 = vmatmul.f32.gmra.mxu2 %v1071_v21 }
 0x5b7   :  { %786 = vmatpush.msrb.mxu3 %v1114_v11 }
 0x5b9   :  { %787 = vmatpush.msrb.mxu3 %v1117_v16 }
 0x5ba   :  { %483 = vmatmul.f32.gmra.mxu0 %v1071_v21  ;;  %524 = vmatmul.f32.gmra.mxu1 %v1071_v21  ;;  %v584_v21 = vlaneseq }
 0x5bb   :  { %788 = vmatpush.msrb.mxu3 %v375_v22 }
 0x5bd   :  { %789 = vmatpush.msrb.mxu3 %v371_v28 }
 0x5be   :  { %445 = vmatmul.f32.gmra.mxu3 %v1074_v24  ;;  %568 = vmatmul.f32.gmra.mxu2 %v1074_v24 }
 0x5bf   :  { %790 = vmatpush.msrb.mxu3 %v367_v34 }
 0x5c1   :  { %791 = vmatpush.msrb.mxu3 %v363_v39 }
 0x5c2   :  { %486 = vmatmul.f32.gmra.mxu0 %v1074_v24  ;;  %527 = vmatmul.f32.gmra.mxu1 %v1074_v24 }
 0x5c3   :  { %792 = vmatpush.msrb.mxu3 %v359_v41 }
 0x5c5   :  { %793 = vmatpush.msrb.mxu3 %v355_v43 }
 0x5c6   :  { %448 = vmatmul.f32.gmra.mxu3 %v1077_v27  ;;  %571 = vmatmul.f32.gmra.mxu2 %v1077_v27 }
 0x5ca   :  { %489 = vmatmul.f32.gmra.mxu0 %v1077_v27  ;;  %530 = vmatmul.f32.gmra.mxu1 %v1077_v27 }
 0x5ce   :  { %451 = vmatmul.f32.gmra.mxu3 %v1080_v30  ;;  %574 = vmatmul.f32.gmra.mxu2 %v1080_v30 }
 0x5d2   :  { %492 = vmatmul.f32.gmra.mxu0 %v1080_v30  ;;  %533 = vmatmul.f32.gmra.mxu1 %v1080_v30  ;;  %v585_v30 = vand.u32 127, %v584_v21 }
 0x5d4   :  { %vm609_vm0 = vcmp.ge.s32.totalorder %v585_v30, 33  ;;  %vm613_vm1 = vcmp.lt.s32.totalorder %v585_v30, 98  ;;  %vm593_vm3 = vcmp.lt.s32.totalorder %v585_v30, 33  ;;  %vm629_vm4 = vcmp.ge.s32.totalorder %v585_v30, 98 }
 0x5d5   :  { %vm617_vm2 = vmand %vm609_vm0, %vm613_vm1  ;;  %v586_v56 = vadd.s32 128, %v585_v30  ;;  %v588_v13 = vadd.s32 384, %v585_v30 }
 0x5d6   :  { %454 = vmatmul.f32.gmra.mxu3 %v1083_v33  ;;  %577 = vmatmul.f32.gmra.mxu2 %v1083_v33 }
 0x5d7   :  { %vm634_vm5 = vcmp.lt.s32.totalorder %v586_v56, 227  ;;  %vm650_vm6 = vcmp.ge.s32.totalorder %v586_v56, 227  ;;  %vm672_vm7 = vcmp.ge.s32.totalorder %v588_v13, 484  ;;  %vm676_vm8 = vcmp.lt.s32.totalorder %v588_v13, 486 }
 0x5d8   :  { %vm692_vm9 = vcmp.ge.s32.totalorder %v588_v13, 486  ;;  %vm696_vm10 = vcmp.lt.s32.totalorder %v588_v13, 489  ;;  %vm680_vm11 = vmand %vm672_vm7, %vm676_vm8  ;;  %vm712_vm12 = vcmp.ge.s32.totalorder %v588_v13, 489  ;;  %vm716_vm13 = vcmp.lt.s32.totalorder %v588_v13, 494 }
 0x5d9   :  { %vm656_vm14 = vcmp.lt.s32.totalorder %v588_v13, 484  ;;  %vm700_vm15 = vmand %vm692_vm9, %vm696_vm10  ;;  %vm732_vm1 = vcmp.ge.s32.totalorder %v588_v13, 494 }
 0x5da   :  { %495 = vmatmul.f32.gmra.mxu0 %v1083_v33  ;;  %536 = vmatmul.f32.gmra.mxu1 %v1083_v33  ;;  %vm720_vm0 = vmand %vm712_vm12, %vm716_vm13 }
 0x5de   :  { %457 = vmatmul.f32.gmra.mxu3 %v1089_v36  ;;  %580 = vmatmul.f32.gmra.mxu2 %v1089_v36 }
 0x5e2   :  { %539 = vmatmul.f32.gmra.mxu1 %v1089_v36 }
 0x5e6   :  { %498 = vmatmul.f32.vlgmr.msrb.gmra.mxu3 %v1089_v36 }
 0x627   :  { %v478_v24 = vpop.f32.mrf.mxu0  ;;  %v519_v27 = vpop.f32.mrf.mxu1 }
 0x629   :  { %v437_v15 = vpop.f32.mrf.mxu3  ;;  %v560_v18 = vpop.f32.mrf.mxu2 }
 0x62a   :  { %v601_v50 = vsel %vm593_vm3, %v437_v15, 0.0 }
 0x62f   :  { %v481_v47 = vpop.f32.mrf.mxu0  ;;  %v522_v33 = vpop.f32.mrf.mxu1 }
 0x631   :  { %v440_v45 = vpop.f32.mrf.mxu3  ;;  %v563_v46 = vpop.f32.mrf.mxu2 }
 0x632   :  { %v621_v48 = vsel %vm617_vm2, %v440_v45, 0.0  ;;  %vm736_vm2 = vcmp.lt.s32.totalorder %v588_v13, 496 }
 0x633   :  { %v625_v36 = vadd.f32 %v621_v48, %v601_v50  ;;  %vm740_vm3 = vmand %vm732_vm1, %vm736_vm2 }
 0x637   :  { %v484_v55 = vpop.f32.mrf.mxu0  ;;  %v525_v57 = vpop.f32.mrf.mxu1 }
 0x638   :  { %v642_v62 = vsel %vm634_vm5, %v484_v55, 0.0 }
 0x639   :  { %v443_v51 = vpop.f32.mrf.mxu3  ;;  %v566_v53 = vpop.f32.mrf.mxu2 }
 0x63a   :  { %v641_v54 = vsel %vm629_vm4, %v443_v51, 0.0 }
 0x63b   :  { %v645_v58 = vadd.f32 %v641_v54, %v625_v36 }
 0x63d   :  { %v758_v59 = vadd.f32 %v750_v52, %v645_v58 }
 0x63f   :  { %762 = vst [vmem:[%s1184_s3] sm:$0xff] %v758_v59  ;;  %v487_v0 = vpop.f32.mrf.mxu0  ;;  %v528_v2 = vpop.f32.mrf.mxu1 }
 0x640   :  { %v662_v3 = vsel %vm650_vm6, %v487_v0, 0.0  ;;  %v760_v4 = vadd.f32 %v752_v60, %v528_v2 }
 0x641   :  { %v446_v61 = vpop.f32.mrf.mxu3  ;;  %v569_v63 = vpop.f32.mrf.mxu2  ;;  %v666_v5 = vadd.f32 %v662_v3, %v642_v62 }
 0x642   :  { %764 = vst [vmem:[%s1184_s3 + $0x10] sm:$0xff] %v760_v4  ;;  %v664_v25 = vsel %vm656_vm14, %v569_v63, 0.0 }
 0x643   :  { %v759_v6 = vadd.f32 %v751_v1, %v666_v5 }
 0x645   :  { %763 = vst [vmem:[%s1184_s3 + $0x8] sm:$0xff] %v759_v6 }
 0x647   :  { %v531_v9 = vpop.f32.mrf.mxu1  ;;  %v490_v10 = vpop.f32.mrf.mxu0 }
 0x649   :  { %v449_v7 = vpop.f32.mrf.mxu3  ;;  %v572_v8 = vpop.f32.mrf.mxu2 }
 0x64a   :  { %v684_v20 = vsel %vm680_vm11, %v572_v8, 0.0 }
 0x64b   :  { %v688_v28 = vadd.f32 %v684_v20, %v664_v25 }
 0x64f   :  { %v534_v14 = vpop.f32.mrf.mxu1  ;;  %v493_v16 = vpop.f32.mrf.mxu0 }
 0x651   :  { %v452_v11 = vpop.f32.mrf.mxu3  ;;  %v575_v12 = vpop.f32.mrf.mxu2 }
 0x652   :  { %v704_v26 = vsel %vm700_vm15, %v575_v12, 0.0 }
 0x653   :  { %v708_v31 = vadd.f32 %v704_v26, %v688_v28 }
 0x657   :  { %v537_v22 = vpop.f32.mrf.mxu1  ;;  %v496_v23 = vpop.f32.mrf.mxu0 }
 0x659   :  { %v455_v17 = vpop.f32.mrf.mxu3  ;;  %v578_v19 = vpop.f32.mrf.mxu2 }
 0x65a   :  { %v724_v29 = vsel %vm720_vm0, %v578_v19, 0.0 }
 0x65b   :  { %v728_v32 = vadd.f32 %v724_v29, %v708_v31 }
 0x65f   :  { %v540_v39 = vpop.f32.mrf.mxu1 }
 0x661   :  { %v458_v34 = vpop.f32.mrf.mxu3  ;;  %v581_v35 = vpop.f32.mrf.mxu2 }
 0x662   :  { %v744_v38 = vsel %vm740_vm3, %v581_v35, 0.0 }
 0x663   :  { %v748_v40 = vadd.f32 %v744_v38, %v728_v32 }
 0x665   :  { %v761_v41 = vadd.f32 %v753_v37, %v748_v40 }
 0x667   :  { %765 = vst [vmem:[%s1184_s3 + $0x18] sm:$0xff] %v761_v41 }
 0x669   :  { %v499_v42 = vpop.f32.mrf.mxu3 }
 0x66a   :  { %770 = vsyncpa [#allocation5], 1 }
 0x66b   :  { %771 = vsyncmov [#allocation3] }
 0x66e   :  { %s772_s4 = vpop.sfrf %771 }
 0x66f   :  { %p777_p0 = scmp.ne.s32.totalorder %s772_s4, 0 }
 0x671   :  { %776 = shalt.err (%p777_p0)  }

</bundles_post_ra>
